<compile_context>
chip_gen: v5e
topology: v5e:2x2
jax: 0.10.0
libtpu: 0.0.40
codegen_flags: <defaults>
</compile_context>

<pallas_src>
import jax
import jax.numpy as jnp
from jax.experimental import pallas as pl
from jax.experimental.pallas import tpu as pltpu


def _round_up(x: int, m: int) -> int:
    return (x + m - 1) // m * m


def _cdiv(a: int, b: int) -> int:
    return -(-a // b)


# ---------------------------------------------------------------------------
# Hardware-aware defaults
# ---------------------------------------------------------------------------

def _vmem_budget_bytes() -> int:
    """~85% of physical VMEM (~108 MiB on v5e/v6e, ~54 MiB on v7x); safe 48 MiB fallback."""
    try:
        cap = int(pltpu.get_tpu_info().vmem_capacity_bytes)
        return min(int(cap * 0.85), 112 * 1024 * 1024)
    except Exception:
        return 48 * 1024 * 1024  # > 32 MiB scoped default, < v7x 64 MiB physical


def _default_tile_m(vmem_budget: int) -> int:
    # 128-MiB-VMEM parts (v5e/v6e) can afford 1024-row token tiles; v7x (64 MiB) gets 512.
    return 1024 if vmem_budget >= 96 * 1024 * 1024 else 512


def _pick_token_tile(n: int, target: int, align: int = 16) -> int:
    """Minimize the number of token tiles (W_out is re-streamed once per token tile), then
    use the smallest tile that still achieves it (minimal padded rows)."""
    n_a = _round_up(max(n, 1), align)
    target = max(align, target // align * align)
    if n_a <= target:
        return n_a
    num_tiles = _cdiv(n_a, target)
    return _round_up(_cdiv(n_a, num_tiles), align)


def _pick_vocab_tile(vp: int, target: int, align: int = 128,
                     max_pad_frac: float = 1.0 / 16.0) -> int:
    """Largest multiple of 128 <= target whose padding of the vocab dim stays small."""
    target = max(align, target // align * align)
    if vp <= target:
        return vp
    for t in range(target, align - 1, -align):
        if _round_up(vp, t) - vp <= vp * max_pad_frac:
            return t
    return align


def _vmem_footprint(tile_m, tile_n, Hp, cbytes, obytes):
    """Rough per-core VMEM footprint with single-buffered resident weights."""
    return (2 * tile_m * Hp * cbytes         # x tile (double-buffered)
            + 2 * Hp * Hp * cbytes           # W1 + W2 (single-buffered via Buffered(1))
            + 2 * Hp * tile_n * cbytes       # W_out vocab tile (double-buffered)
            + 2 * tile_m * tile_n * obytes   # logits tile (double-buffered)
            + tile_m * Hp * cbytes)          # hidden-activation scratch


# ---------------------------------------------------------------------------
# Kernel
# ---------------------------------------------------------------------------

def fc_model_kernel(x_ref, w1_ref, b1_ref, w2_ref, b2_ref, wo_ref, bo_ref, o_ref, h_ref):
    """One (token tile i, vocab tile j) grid step.

    The vocab axis j is innermost and 'arbitrary': at j == 0 the hidden stack runs once for
    this token tile, is cached in VMEM scratch h_ref, and every vocab tile reuses it for the
    output projection. At j == 0 the live value also feeds the output dot directly (no
    store->reload on the critical path).
    """
    j = pl.program_id(1)

    def out_proj(h):
        logits = jnp.dot(h, wo_ref[...], preferred_element_type=jnp.float32) + bo_ref[...]
        return logits.astype(o_ref.dtype)

    @pl.when(j == 0)
    def _():
        # ReLU(embed) was already folded into the embedding table, so x feeds the MXU directly.
        h = jnp.dot(x_ref[...], w1_ref[...], preferred_element_type=jnp.float32) + b1_ref[...]
        h = jnp.maximum(h, 0.0).astype(w2_ref.dtype)                    # hidden block 1
        h = jnp.dot(h, w2_ref[...], preferred_element_type=jnp.float32) + b2_ref[...]
        h = jnp.maximum(h, 0.0).astype(h_ref.dtype)                     # hidden block 2
        h_ref[...] = h                  # cache for the remaining vocab tiles
        o_ref[...] = out_proj(h)        # use the live value at j == 0

    @pl.when(j != 0)
    def _():
        o_ref[...] = out_proj(h_ref[...])


def _build_call(*, Np, Vp, Hp, tile_m, tile_n, compute_dtype, out_dtype,
                vmem_limit, flops, bytes_accessed, single_buffer_weights):
    resident = {"pipeline_mode": pl.Buffered(1)} if single_buffer_weights else {}
    grid = (Np // tile_m, Vp // tile_n)
    return pl.pallas_call(
        fc_model_kernel,
        out_shape=jax.ShapeDtypeStruct((Np, Vp), out_dtype),
        grid_spec=pltpu.PrefetchScalarGridSpec(
            num_scalar_prefetch=0,
            grid=grid,
            in_specs=[
                pl.BlockSpec((tile_m, Hp), lambda i, j: (i, 0)),          # gathered embeddings
                pl.BlockSpec((Hp, Hp), lambda i, j: (0, 0), **resident),  # W1 (in, out), resident
                pl.BlockSpec((1, Hp), lambda i, j: (0, 0), **resident),   # b1
                pl.BlockSpec((Hp, Hp), lambda i, j: (0, 0), **resident),  # W2 (in, out), resident
                pl.BlockSpec((1, Hp), lambda i, j: (0, 0), **resident),   # b2
                pl.BlockSpec((Hp, tile_n), lambda i, j: (0, j)),          # W_out vocab tile
                pl.BlockSpec((1, tile_n), lambda i, j: (0, j)),           # b_out vocab tile
            ],
            out_specs=pl.BlockSpec((tile_m, tile_n), lambda i, j: (i, j)),
            scratch_shapes=[pltpu.VMEM((tile_m, Hp), compute_dtype)],     # cached hidden acts
        ),
        compiler_params=pltpu.CompilerParams(
            dimension_semantics=("parallel", "arbitrary"),
            vmem_limit_bytes=int(vmem_limit),
        ),
        cost_estimate=pl.CostEstimate(flops=int(flops), transcendentals=0,
                                      bytes_accessed=int(bytes_accessed)),
    )


# ---------------------------------------------------------------------------
# One-time parameter prep + forward
# ---------------------------------------------------------------------------

def prepare_params(params, *, compute_dtype=jnp.bfloat16, tile_n=256):
    """One-time parameter prep (hoisted out of the per-step forward).

    Pre-applies ReLU to the embedding table (ReLU(E)[ids] == ReLU(E[ids])), zero-pads every
    tensor to lane-aligned shapes (padding contributes exactly 0), casts to `compute_dtype`,
    and picks a vocab tile that (near-)divides the padded vocab dimension.
    """
    embed, w1, b1, w2, b2, wo, bo = params
    V, H = embed.shape
    Hp = _round_up(H, 128)
    Vp0 = _round_up(V, 128)
    tile_n = _pick_vocab_tile(Vp0, tile_n)
    Vp = _round_up(Vp0, tile_n)

    f32 = jnp.float32
    embed_p = jnp.zeros((V, Hp), compute_dtype).at[:, :H].set(
        jnp.maximum(embed, 0.0).astype(compute_dtype))
    w1_p = jnp.zeros((Hp, Hp), compute_dtype).at[:H, :H].set(w1.astype(compute_dtype))
    w2_p = jnp.zeros((Hp, Hp), compute_dtype).at[:H, :H].set(w2.astype(compute_dtype))
    wo_p = jnp.zeros((Hp, Vp), compute_dtype).at[:H, :V].set(wo.astype(compute_dtype))
    b1_p = jnp.zeros((1, Hp), f32).at[0, :H].set(b1.astype(f32))
    b2_p = jnp.zeros((1, Hp), f32).at[0, :H].set(b2.astype(f32))
    bo_p = jnp.zeros((1, Vp), f32).at[0, :V].set(bo.astype(f32))

    return dict(embed=embed_p, w1=w1_p, b1=b1_p, w2=w2_p, b2=b2_p, wo=wo_p, bo=bo_p,
                V=V, H=H, Hp=Hp, Vp=Vp, tile_n=tile_n, compute_dtype=compute_dtype)


def fc_model_forward(input_ids, prepared, *, tile_m=None, out_dtype=None):
    """input_ids: (B, S) int32 -> logits (B, S, vocab_size).

    `prepared` must come from prepare_params(); its padded/cast tensors are reused per call.
    """
    compute_dtype = prepared["compute_dtype"]
    out_dtype = compute_dtype if out_dtype is None else out_dtype
    V, Hp, Vp, tile_n = prepared["V"], prepared["Hp"], prepared["Vp"], prepared["tile_n"]

    B, S = input_ids.shape
    N = B * S

    vmem_limit = _vmem_budget_bytes()
    if tile_m is None:
        tile_m = _default_tile_m(vmem_limit)
    tile_m = _pick_token_tile(N, tile_m)

    cbytes = jnp.dtype(compute_dtype).itemsize
    obytes = jnp.dtype(out_dtype).itemsize
    # Shrink the token tile if the footprint would blow the VMEM budget.
    while tile_m > 16 and _vmem_footprint(tile_m, tile_n, Hp, cbytes, obytes) > 0.85 * vmem_limit:
        tile_m = _pick_token_tile(N, tile_m // 2)
    # TODO(synk): K-tile W1/W2 (extra reduction grid axis) when Hp >= 2048; shrinking tile_m
    #             alone cannot fit resident (Hp, Hp) weights on v7x at that size.

    Np = _round_up(_round_up(N, 16), tile_m)

    # Embedding gather (JAX glue): rows are already ReLU'd, lane-padded and in compute dtype.
    # TODO(synk): fuse this gather in-kernel to avoid the (N, Hp) HBM round trip for large N.
    x = jnp.take(prepared["embed"], input_ids.reshape(-1), axis=0)  # (N, Hp)
    if Np != N:
        x = jnp.pad(x, ((0, Np - N), (0, 0)))  # padded rows -> garbage logits, sliced off below

    flops = 2 * Np * Hp * (2 * Hp + Vp)
    bytes_accessed = (Np * Hp * cbytes + 2 * Hp * Hp * cbytes + Hp * Vp * cbytes
                      + (2 * Hp + Vp) * 4 + Np * Vp * obytes)

    kwargs = dict(Np=Np, Vp=Vp, Hp=Hp, tile_m=tile_m, tile_n=tile_n,
                  compute_dtype=compute_dtype, out_dtype=out_dtype,
                  vmem_limit=vmem_limit, flops=flops, bytes_accessed=bytes_accessed)
    operands = (x, prepared["w1"], prepared["b1"], prepared["w2"], prepared["b2"],
                prepared["wo"], prepared["bo"])
    try:
        out = _build_call(single_buffer_weights=True, **kwargs)(*operands)
    except Exception:
        # pl.Buffered(1) unsupported on this jax version: fall back to default double buffering
        # (identical semantics, only costs extra VMEM).
        out = _build_call(single_buffer_weights=False, **kwargs)(*operands)

    return out[:N, :V].reshape(B, S, V)


# ---------------------------------------------------------------------------
# Deterministic init + pure-JAX reference
# ---------------------------------------------------------------------------

def init_params(key, vocab_size, hidden_units):
    """FCModel(vocab_size, hidden_units, num_layers=3) shapes.
    Linear weights stored transposed: (in_features, out_features)."""
    k_e, k1, kb1, k2, kb2, ko, kbo = jax.random.split(key, 7)
    H, V = hidden_units, vocab_size
    lim_h = 1.0 / jnp.sqrt(H)
    embed = jax.random.normal(k_e, (V, H), jnp.float32)                  # nn.Embedding
    w1 = jax.random.uniform(k1, (H, H), jnp.float32, -lim_h, lim_h)      # Linear(H, H)
    b1 = jax.random.uniform(kb1, (H,), jnp.float32, -lim_h, lim_h)
    w2 = jax.random.uniform(k2, (H, H), jnp.float32, -lim_h, lim_h)      # Linear(H, H)
    b2 = jax.random.uniform(kb2, (H,), jnp.float32, -lim_h, lim_h)
    wo = jax.random.uniform(ko, (H, V), jnp.float32, -lim_h, lim_h)      # Linear(H, V)
    bo = jax.random.uniform(kbo, (V,), jnp.float32, -lim_h, lim_h)
    return (embed, w1, b1, w2, b2, wo, bo)


def reference_forward(input_ids, params):
    embed, w1, b1, w2, b2, wo, bo = params
    x = jnp.take(embed, input_ids, axis=0)   # (B, S, H)
    x = jnp.maximum(x, 0.0)
    x = jnp.maximum(x @ w1 + b1, 0.0)
    x = jnp.maximum(x @ w2 + b2, 0.0)
    return x @ wo + bo


if __name__ == "__main__":
    vocab_size, hidden_units = 64, 32
    batch, seq = 2, 8

    key = jax.random.PRNGKey(0)
    k_params, k_ids = jax.random.split(key)
    params = init_params(k_params, vocab_size, hidden_units)
    input_ids = jax.random.randint(k_ids, (batch, seq), 0, vocab_size, dtype=jnp.int32)

    ref = reference_forward(input_ids, params)

    # Exact-math path (f32 operands, f32 logits) validates structure / padding / tiling.
    prep_f32 = prepare_params(params, compute_dtype=jnp.float32)
    logits_f32 = jax.block_until_ready(
        fc_model_forward(input_ids, prep_f32, out_dtype=jnp.float32))
    assert logits_f32.shape == (batch, seq, vocab_size)
    assert jnp.allclose(logits_f32, ref, atol=1e-3, rtol=1e-3)

    # Production mixed-precision path: bf16 operands + bf16 logits, f32 MXU accumulation.
    prep_bf16 = prepare_params(params)          # one-time prep, reused across steps
    logits_bf16 = jax.block_until_ready(fc_model_forward(input_ids, prep_bf16))
    assert logits_bf16.shape == (batch, seq, vocab_size)
    assert jnp.allclose(logits_bf16.astype(jnp.float32), ref, atol=5e-2, rtol=5e-2)

    print("KERNEL_OK")
</pallas_src>

<mosaic_0001>
module attributes {stable_mosaic.version = 11 : i64} {
  func.func @fc_model_kernel(%arg0: i32, %arg1: i32, %arg2: memref<16x128xf32, #tpu.memory_space<vmem>>, %arg3: memref<128x128xf32, #tpu.memory_space<vmem>>, %arg4: memref<1x128xf32, #tpu.memory_space<vmem>>, %arg5: memref<128x128xf32, #tpu.memory_space<vmem>>, %arg6: memref<1x128xf32, #tpu.memory_space<vmem>>, %arg7: memref<128x128xf32, #tpu.memory_space<vmem>>, %arg8: memref<1x128xf32, #tpu.memory_space<vmem>>, %arg9: memref<16x128xf32, #tpu.memory_space<vmem>>, %arg10: memref<16x128xf32, #tpu.memory_space<vmem>>) attributes {dimension_semantics = [#tpu.dimension_semantics<parallel>, #tpu.dimension_semantics<arbitrary>], iteration_bounds = array<i64: 1, 1>, scalar_prefetch = 0 : i64, scratch_operands = 1 : i64, tpu.core_type = #tpu.core_type<tc>, window_params = [{transform_indices = @transform_0, window_bounds = array<i64: 16, 128>}, {pipeline_mode = #tpu.pipeline_mode<synchronous>, transform_indices = @transform_1, window_bounds = array<i64: 128, 128>}, {pipeline_mode = #tpu.pipeline_mode<synchronous>, transform_indices = @transform_2, window_bounds = array<i64: 1, 128>}, {pipeline_mode = #tpu.pipeline_mode<synchronous>, transform_indices = @transform_3, window_bounds = array<i64: 128, 128>}, {pipeline_mode = #tpu.pipeline_mode<synchronous>, transform_indices = @transform_4, window_bounds = array<i64: 1, 128>}, {transform_indices = @transform_5, window_bounds = array<i64: 128, 128>}, {transform_indices = @transform_6, window_bounds = array<i64: 1, 128>}, {transform_indices = @transform_7, window_bounds = array<i64: 16, 128>}]} {
    %c0_i32 = arith.constant 0 : i32
    %0 = arith.cmpi eq, %arg1, %c0_i32 : i32
    %1 = arith.extui %0 : i1 to i32
    %c0_i32_0 = arith.constant 0 : i32
    %2 = arith.cmpi ne, %1, %c0_i32_0 : i32
    scf.if %2 {
      %c0 = arith.constant 0 : index
      %c0_3 = arith.constant 0 : index
      %6 = vector.load %arg2[%c0, %c0_3] : memref<16x128xf32, #tpu.memory_space<vmem>>, vector<16x128xf32>
      %c0_4 = arith.constant 0 : index
      %c0_5 = arith.constant 0 : index
      %7 = vector.load %arg3[%c0_4, %c0_5] : memref<128x128xf32, #tpu.memory_space<vmem>>, vector<128x128xf32>
      %cst = arith.constant dense<0.000000e+00> : vector<16x128xf32>
      %8 = tpu.matmul %6, %7, %cst {dimension_numbers = #tpu.dot_dimension_numbers<[1], [0], [0], [1], [0, 0, 1, 1], [], []>} : vector<16x128xf32>, vector<128x128xf32>, vector<16x128xf32> -> vector<16x128xf32>
      %c0_6 = arith.constant 0 : index
      %c0_7 = arith.constant 0 : index
      %9 = vector.load %arg4[%c0_6, %c0_7] : memref<1x128xf32, #tpu.memory_space<vmem>>, vector<1x128xf32>
      %10 = vector.broadcast %9 : vector<1x128xf32> to vector<16x128xf32>
      %11 = arith.addf %8, %10 : vector<16x128xf32>
      %cst_8 = arith.constant 0.000000e+00 : f32
      %12 = vector.broadcast %cst_8 : f32 to vector<16x128xf32>
      %13 = arith.maximumf %11, %12 : vector<16x128xf32>
      %c0_9 = arith.constant 0 : index
      %c0_10 = arith.constant 0 : index
      %14 = vector.load %arg5[%c0_9, %c0_10] : memref<128x128xf32, #tpu.memory_space<vmem>>, vector<128x128xf32>
      %cst_11 = arith.constant dense<0.000000e+00> : vector<16x128xf32>
      %15 = tpu.matmul %13, %14, %cst_11 {dimension_numbers = #tpu.dot_dimension_numbers<[1], [0], [0], [1], [0, 0, 1, 1], [], []>} : vector<16x128xf32>, vector<128x128xf32>, vector<16x128xf32> -> vector<16x128xf32>
      %c0_12 = arith.constant 0 : index
      %c0_13 = arith.constant 0 : index
      %16 = vector.load %arg6[%c0_12, %c0_13] : memref<1x128xf32, #tpu.memory_space<vmem>>, vector<1x128xf32>
      %17 = vector.broadcast %16 : vector<1x128xf32> to vector<16x128xf32>
      %18 = arith.addf %15, %17 : vector<16x128xf32>
      %cst_14 = arith.constant 0.000000e+00 : f32
      %19 = vector.broadcast %cst_14 : f32 to vector<16x128xf32>
      %20 = arith.maximumf %18, %19 : vector<16x128xf32>
      %c0_15 = arith.constant 0 : index
      %c0_16 = arith.constant 0 : index
      %21 = vector.load %arg10[%c0_15, %c0_16] : memref<16x128xf32, #tpu.memory_space<vmem>>, vector<16x128xf32>
      tpu.vector_store %arg10[%c0_15, %c0_16], %20 {strides = array<i32>} : memref<16x128xf32, #tpu.memory_space<vmem>>, vector<16x128xf32>,
      %c0_17 = arith.constant 0 : index
      %c0_18 = arith.constant 0 : index
      %22 = vector.load %arg7[%c0_17, %c0_18] : memref<128x128xf32, #tpu.memory_space<vmem>>, vector<128x128xf32>
      %cst_19 = arith.constant dense<0.000000e+00> : vector<16x128xf32>
      %23 = tpu.matmul %20, %22, %cst_19 {dimension_numbers = #tpu.dot_dimension_numbers<[1], [0], [0], [1], [0, 0, 1, 1], [], []>} : vector<16x128xf32>, vector<128x128xf32>, vector<16x128xf32> -> vector<16x128xf32>
      %c0_20 = arith.constant 0 : index
      %c0_21 = arith.constant 0 : index
      %24 = vector.load %arg8[%c0_20, %c0_21] : memref<1x128xf32, #tpu.memory_space<vmem>>, vector<1x128xf32>
      %25 = vector.broadcast %24 : vector<1x128xf32> to vector<16x128xf32>
      %26 = arith.addf %23, %25 : vector<16x128xf32>
      %c0_22 = arith.constant 0 : index
      %c0_23 = arith.constant 0 : index
      %27 = vector.load %arg9[%c0_22, %c0_23] : memref<16x128xf32, #tpu.memory_space<vmem>>, vector<16x128xf32>
      tpu.vector_store %arg9[%c0_22, %c0_23], %26 {strides = array<i32>} : memref<16x128xf32, #tpu.memory_space<vmem>>, vector<16x128xf32>,
    } else {
    }
    %c0_i32_1 = arith.constant 0 : i32
    %3 = arith.cmpi ne, %arg1, %c0_i32_1 : i32
    %4 = arith.extui %3 : i1 to i32
    %c0_i32_2 = arith.constant 0 : i32
    %5 = arith.cmpi ne, %4, %c0_i32_2 : i32
    scf.if %5 {
      %c0 = arith.constant 0 : index
      %c0_3 = arith.constant 0 : index
      %6 = vector.load %arg10[%c0, %c0_3] : memref<16x128xf32, #tpu.memory_space<vmem>>, vector<16x128xf32>
      %c0_4 = arith.constant 0 : index
      %c0_5 = arith.constant 0 : index
      %7 = vector.load %arg7[%c0_4, %c0_5] : memref<128x128xf32, #tpu.memory_space<vmem>>, vector<128x128xf32>
      %cst = arith.constant dense<0.000000e+00> : vector<16x128xf32>
      %8 = tpu.matmul %6, %7, %cst {dimension_numbers = #tpu.dot_dimension_numbers<[1], [0], [0], [1], [0, 0, 1, 1], [], []>} : vector<16x128xf32>, vector<128x128xf32>, vector<16x128xf32> -> vector<16x128xf32>
      %c0_6 = arith.constant 0 : index
      %c0_7 = arith.constant 0 : index
      %9 = vector.load %arg8[%c0_6, %c0_7] : memref<1x128xf32, #tpu.memory_space<vmem>>, vector<1x128xf32>
      %10 = vector.broadcast %9 : vector<1x128xf32> to vector<16x128xf32>
      %11 = arith.addf %8, %10 : vector<16x128xf32>
      %c0_8 = arith.constant 0 : index
      %c0_9 = arith.constant 0 : index
      %12 = vector.load %arg9[%c0_8, %c0_9] : memref<16x128xf32, #tpu.memory_space<vmem>>, vector<16x128xf32>
      tpu.vector_store %arg9[%c0_8, %c0_9], %11 {strides = array<i32>} : memref<16x128xf32, #tpu.memory_space<vmem>>, vector<16x128xf32>,
    } else {
    }
    return
  }
  func.func @transform_0(%arg0: i32, %arg1: i32) -> (i32, i32) {
    %c0_i32 = arith.constant 0 : i32
    %c0_i32_0 = arith.constant 0 : i32
    return %arg0, %c0_i32 : i32, i32
  }
  func.func @transform_1(%arg0: i32, %arg1: i32) -> (i32, i32) {
    %c0_i32 = arith.constant 0 : i32
    %c0_i32_0 = arith.constant 0 : i32
    %c0_i32_1 = arith.constant 0 : i32
    return %c0_i32, %c0_i32_0 : i32, i32
  }
  func.func @transform_2(%arg0: i32, %arg1: i32) -> (i32, i32) {
    %c0_i32 = arith.constant 0 : i32
    %c0_i32_0 = arith.constant 0 : i32
    %c0_i32_1 = arith.constant 0 : i32
    return %c0_i32, %c0_i32_0 : i32, i32
  }
  func.func @transform_3(%arg0: i32, %arg1: i32) -> (i32, i32) {
    %c0_i32 = arith.constant 0 : i32
    %c0_i32_0 = arith.constant 0 : i32
    %c0_i32_1 = arith.constant 0 : i32
    return %c0_i32, %c0_i32_0 : i32, i32
  }
  func.func @transform_4(%arg0: i32, %arg1: i32) -> (i32, i32) {
    %c0_i32 = arith.constant 0 : i32
    %c0_i32_0 = arith.constant 0 : i32
    %c0_i32_1 = arith.constant 0 : i32
    return %c0_i32, %c0_i32_0 : i32, i32
  }
  func.func @transform_5(%arg0: i32, %arg1: i32) -> (i32, i32) {
    %c0_i32 = arith.constant 0 : i32
    %c0_i32_0 = arith.constant 0 : i32
    return %c0_i32, %arg1 : i32, i32
  }
  func.func @transform_6(%arg0: i32, %arg1: i32) -> (i32, i32) {
    %c0_i32 = arith.constant 0 : i32
    %c0_i32_0 = arith.constant 0 : i32
    return %c0_i32, %arg1 : i32, i32
  }
  func.func @transform_7(%arg0: i32, %arg1: i32) -> (i32, i32) {
    %c0_i32 = arith.constant 0 : i32
    return %arg0, %arg1 : i32, i32
  }
}

module attributes {stable_mosaic.version = 11 : i64} {
  func.func @fc_model_kernel(%arg0: i32, %arg1: i32, %arg2: memref<16x128xf32, #tpu.memory_space<vmem>>, %arg3: memref<128x128xf32, #tpu.memory_space<vmem>>, %arg4: memref<1x128xf32, #tpu.memory_space<vmem>>, %arg5: memref<128x128xf32, #tpu.memory_space<vmem>>, %arg6: memref<1x128xf32, #tpu.memory_space<vmem>>, %arg7: memref<128x128xf32, #tpu.memory_space<vmem>>, %arg8: memref<1x128xf32, #tpu.memory_space<vmem>>, %arg9: memref<16x128xf32, #tpu.memory_space<vmem>>, %arg10: memref<16x128xf32, #tpu.memory_space<vmem>>) attributes {dimension_semantics = [#tpu.dimension_semantics<parallel>, #tpu.dimension_semantics<arbitrary>], iteration_bounds = array<i64: 1, 1>, scalar_prefetch = 0 : i64, scratch_operands = 1 : i64, tpu.core_type = #tpu.core_type<tc>, window_params = [{transform_indices = @transform_0, window_bounds = array<i64: 16, 128>}, {pipeline_mode = #tpu.pipeline_mode<synchronous>, transform_indices = @transform_1, window_bounds = array<i64: 128, 128>}, {pipeline_mode = #tpu.pipeline_mode<synchronous>, transform_indices = @transform_2, window_bounds = array<i64: 1, 128>}, {pipeline_mode = #tpu.pipeline_mode<synchronous>, transform_indices = @transform_3, window_bounds = array<i64: 128, 128>}, {pipeline_mode = #tpu.pipeline_mode<synchronous>, transform_indices = @transform_4, window_bounds = array<i64: 1, 128>}, {transform_indices = @transform_5, window_bounds = array<i64: 128, 128>}, {transform_indices = @transform_6, window_bounds = array<i64: 1, 128>}, {transform_indices = @transform_7, window_bounds = array<i64: 16, 128>}]} {
    %c0_i32 = arith.constant 0 : i32
    %0 = arith.cmpi eq, %arg1, %c0_i32 : i32
    %1 = arith.extui %0 : i1 to i32
    %c0_i32_0 = arith.constant 0 : i32
    %2 = arith.cmpi ne, %1, %c0_i32_0 : i32
    scf.if %2 {
      %c0 = arith.constant 0 : index
      %c0_3 = arith.constant 0 : index
      %6 = vector.load %arg2[%c0, %c0_3] : memref<16x128xf32, #tpu.memory_space<vmem>>, vector<16x128xf32>
      %c0_4 = arith.constant 0 : index
      %c0_5 = arith.constant 0 : index
      %7 = vector.load %arg3[%c0_4, %c0_5] : memref<128x128xf32, #tpu.memory_space<vmem>>, vector<128x128xf32>
      %cst = arith.constant dense<0.000000e+00> : vector<16x128xf32>
      %8 = tpu.matmul %6, %7, %cst {dimension_numbers = #tpu.dot_dimension_numbers<[1], [0], [0], [1], [0, 0, 1, 1], [], []>} : vector<16x128xf32>, vector<128x128xf32>, vector<16x128xf32> -> vector<16x128xf32>
      %c0_6 = arith.constant 0 : index
      %c0_7 = arith.constant 0 : index
      %9 = vector.load %arg4[%c0_6, %c0_7] : memref<1x128xf32, #tpu.memory_space<vmem>>, vector<1x128xf32>
      %10 = vector.broadcast %9 : vector<1x128xf32> to vector<16x128xf32>
      %11 = arith.addf %8, %10 : vector<16x128xf32>
      %cst_8 = arith.constant 0.000000e+00 : f32
      %12 = vector.broadcast %cst_8 : f32 to vector<16x128xf32>
      %13 = arith.maximumf %11, %12 : vector<16x128xf32>
      %c0_9 = arith.constant 0 : index
      %c0_10 = arith.constant 0 : index
      %14 = vector.load %arg5[%c0_9, %c0_10] : memref<128x128xf32, #tpu.memory_space<vmem>>, vector<128x128xf32>
      %cst_11 = arith.constant dense<0.000000e+00> : vector<16x128xf32>
      %15 = tpu.matmul %13, %14, %cst_11 {dimension_numbers = #tpu.dot_dimension_numbers<[1], [0], [0], [1], [0, 0, 1, 1], [], []>} : vector<16x128xf32>, vector<128x128xf32>, vector<16x128xf32> -> vector<16x128xf32>
      %c0_12 = arith.constant 0 : index
      %c0_13 = arith.constant 0 : index
      %16 = vector.load %arg6[%c0_12, %c0_13] : memref<1x128xf32, #tpu.memory_space<vmem>>, vector<1x128xf32>
      %17 = vector.broadcast %16 : vector<1x128xf32> to vector<16x128xf32>
      %18 = arith.addf %15, %17 : vector<16x128xf32>
      %cst_14 = arith.constant 0.000000e+00 : f32
      %19 = vector.broadcast %cst_14 : f32 to vector<16x128xf32>
      %20 = arith.maximumf %18, %19 : vector<16x128xf32>
      %c0_15 = arith.constant 0 : index
      %c0_16 = arith.constant 0 : index
      %21 = vector.load %arg10[%c0_15, %c0_16] : memref<16x128xf32, #tpu.memory_space<vmem>>, vector<16x128xf32>
      tpu.vector_store %arg10[%c0_15, %c0_16], %20 {strides = array<i32>} : memref<16x128xf32, #tpu.memory_space<vmem>>, vector<16x128xf32>,
      %c0_17 = arith.constant 0 : index
      %c0_18 = arith.constant 0 : index
      %22 = vector.load %arg7[%c0_17, %c0_18] : memref<128x128xf32, #tpu.memory_space<vmem>>, vector<128x128xf32>
      %cst_19 = arith.constant dense<0.000000e+00> : vector<16x128xf32>
      %23 = tpu.matmul %20, %22, %cst_19 {dimension_numbers = #tpu.dot_dimension_numbers<[1], [0], [0], [1], [0, 0, 1, 1], [], []>} : vector<16x128xf32>, vector<128x128xf32>, vector<16x128xf32> -> vector<16x128xf32>
      %c0_20 = arith.constant 0 : index
      %c0_21 = arith.constant 0 : index
      %24 = vector.load %arg8[%c0_20, %c0_21] : memref<1x128xf32, #tpu.memory_space<vmem>>, vector<1x128xf32>
      %25 = vector.broadcast %24 : vector<1x128xf32> to vector<16x128xf32>
      %26 = arith.addf %23, %25 : vector<16x128xf32>
      %c0_22 = arith.constant 0 : index
      %c0_23 = arith.constant 0 : index
      %27 = vector.load %arg9[%c0_22, %c0_23] : memref<16x128xf32, #tpu.memory_space<vmem>>, vector<16x128xf32>
      tpu.vector_store %arg9[%c0_22, %c0_23], %26 {strides = array<i32>} : memref<16x128xf32, #tpu.memory_space<vmem>>, vector<16x128xf32>,
    } else {
    }
    %c0_i32_1 = arith.constant 0 : i32
    %3 = arith.cmpi ne, %arg1, %c0_i32_1 : i32
    %4 = arith.extui %3 : i1 to i32
    %c0_i32_2 = arith.constant 0 : i32
    %5 = arith.cmpi ne, %4, %c0_i32_2 : i32
    scf.if %5 {
      %c0 = arith.constant 0 : index
      %c0_3 = arith.constant 0 : index
      %6 = vector.load %arg10[%c0, %c0_3] : memref<16x128xf32, #tpu.memory_space<vmem>>, vector<16x128xf32>
      %c0_4 = arith.constant 0 : index
      %c0_5 = arith.constant 0 : index
      %7 = vector.load %arg7[%c0_4, %c0_5] : memref<128x128xf32, #tpu.memory_space<vmem>>, vector<128x128xf32>
      %cst = arith.constant dense<0.000000e+00> : vector<16x128xf32>
      %8 = tpu.matmul %6, %7, %cst {dimension_numbers = #tpu.dot_dimension_numbers<[1], [0], [0], [1], [0, 0, 1, 1], [], []>} : vector<16x128xf32>, vector<128x128xf32>, vector<16x128xf32> -> vector<16x128xf32>
      %c0_6 = arith.constant 0 : index
      %c0_7 = arith.constant 0 : index
      %9 = vector.load %arg8[%c0_6, %c0_7] : memref<1x128xf32, #tpu.memory_space<vmem>>, vector<1x128xf32>
      %10 = vector.broadcast %9 : vector<1x128xf32> to vector<16x128xf32>
      %11 = arith.addf %8, %10 : vector<16x128xf32>
      %c0_8 = arith.constant 0 : index
      %c0_9 = arith.constant 0 : index
      %12 = vector.load %arg9[%c0_8, %c0_9] : memref<16x128xf32, #tpu.memory_space<vmem>>, vector<16x128xf32>
      tpu.vector_store %arg9[%c0_8, %c0_9], %11 {strides = array<i32>} : memref<16x128xf32, #tpu.memory_space<vmem>>, vector<16x128xf32>,
    } else {
    }
    return
  }
  func.func @transform_0(%arg0: i32, %arg1: i32) -> (i32, i32) {
    %c0_i32 = arith.constant 0 : i32
    %c0_i32_0 = arith.constant 0 : i32
    return %arg0, %c0_i32 : i32, i32
  }
  func.func @transform_1(%arg0: i32, %arg1: i32) -> (i32, i32) {
    %c0_i32 = arith.constant 0 : i32
    %c0_i32_0 = arith.constant 0 : i32
    %c0_i32_1 = arith.constant 0 : i32
    return %c0_i32, %c0_i32_0 : i32, i32
  }
  func.func @transform_2(%arg0: i32, %arg1: i32) -> (i32, i32) {
    %c0_i32 = arith.constant 0 : i32
    %c0_i32_0 = arith.constant 0 : i32
    %c0_i32_1 = arith.constant 0 : i32
    return %c0_i32, %c0_i32_0 : i32, i32
  }
  func.func @transform_3(%arg0: i32, %arg1: i32) -> (i32, i32) {
    %c0_i32 = arith.constant 0 : i32
    %c0_i32_0 = arith.constant 0 : i32
    %c0_i32_1 = arith.constant 0 : i32
    return %c0_i32, %c0_i32_0 : i32, i32
  }
  func.func @transform_4(%arg0: i32, %arg1: i32) -> (i32, i32) {
    %c0_i32 = arith.constant 0 : i32
    %c0_i32_0 = arith.constant 0 : i32
    %c0_i32_1 = arith.constant 0 : i32
    return %c0_i32, %c0_i32_0 : i32, i32
  }
  func.func @transform_5(%arg0: i32, %arg1: i32) -> (i32, i32) {
    %c0_i32 = arith.constant 0 : i32
    %c0_i32_0 = arith.constant 0 : i32
    return %c0_i32, %arg1 : i32, i32
  }
  func.func @transform_6(%arg0: i32, %arg1: i32) -> (i32, i32) {
    %c0_i32 = arith.constant 0 : i32
    %c0_i32_0 = arith.constant 0 : i32
    return %c0_i32, %arg1 : i32, i32
  }
  func.func @transform_7(%arg0: i32, %arg1: i32) -> (i32, i32) {
    %c0_i32 = arith.constant 0 : i32
    return %arg0, %arg1 : i32, i32
  }
}

</mosaic_0001>

<bundles_post_ra>
// kernel: tpu_custom_call.1
= control target key start
LH: loop header
LB: loop body
LE: loop exit
PB: predicated region body
PF: predicated region fallthrough
CT: control target
= control target key end

     0   :  { %12 = vsyncpa [#allocation4], 0  ;;  %s545_s0 = inlined_call_operand.hbm [shape: f32[16,128], index: 0, kind: input, shape index: {}]   ;;  %s546_s1 = inlined_call_operand.hbm [shape: f32[128,128], index: 1, kind: input, shape index: {}]   ;;  %s547_s2 = inlined_call_operand.vmem [shape: f32[1,128], index: 2, kind: input, shape index: {}]   ;;  %s548_s3 = inlined_call_operand.hbm [shape: f32[128,128], index: 3, kind: input, shape index: {}]   ;;  %s549_s4 = inlined_call_operand.vmem [shape: f32[1,128], index: 4, kind: input, shape index: {}]   ;;  %s550_s5 = inlined_call_operand.hbm [shape: f32[128,128], index: 5, kind: input, shape index: {}]   ;;  %s551_s6 = inlined_call_operand.vmem [shape: f32[1,128], index: 6, kind: input, shape index: {}]   ;;  %s552_s7 = inlined_call_operand.hbm [shape: f32[16,128], index: 7, kind: output, shape index: {}]  }
   0x1   :  { %13 = vsyncpa [#allocation7], 0 }
   0x2   :  { %14 = vsyncpa [#allocation10], 0 }
   0x3   :  { %15 = vsyncpa [#allocation5], 0  ;;  %s33_s26 = sshll.u32 %s546_s1, 4  ;;  %s459_s27 = smov [#allocation6]   ;;  %s34_s26 = int_to_ptr.hbm [resolvable:$true] %s33_s26 }
   0x4   :  { %s35_s28 = sshll.u32 %s459_s27, 4  ;;  %s20_s8 = sshll.u32 %s545_s0, 4  ;;  %s36_s28 = int_to_ptr.vmem [resolvable:$true] %s35_s28  ;;  %s21_s8 = int_to_ptr.hbm [resolvable:$true] %s20_s8 }
   0x5   :  { %s460_s9 = smov 128   ;;  %s461_s10 = smov 8  }
   0x6   :  { %41 = dma.hbm_to_vmem [thread:$0]  %s34_s26, 2048, %s36_s28, [#allocation7], %s460_s9, %s460_s9, %s461_s10  }
   0x7   :  { %s462_s11 = smov [#allocation3]   ;;  %s48_s1 = sshll.u32 %s548_s3, 4  ;;  %s49_s1 = int_to_ptr.hbm [resolvable:$true] %s48_s1 }
   0x8   :  { %s22_s12 = sshll.u32 %s462_s11, 4  ;;  %s63_s16 = sshll.u32 %s550_s5, 4  ;;  %s23_s12 = int_to_ptr.vmem [resolvable:$true] %s22_s12  ;;  %s64_s16 = int_to_ptr.hbm [resolvable:$true] %s63_s16 }
   0x9   :  { %28 = dma.hbm_to_vmem [thread:$0]  %s21_s8, 256, %s23_s12, [#allocation4], %s460_s9, %s460_s9, %s461_s10  }
   0xa   :  { %s463_s17 = smov [#allocation8]   ;;  %s464_s19 = smov [#allocation9]  }
   0xb   :  { %s50_s18 = sshll.u32 %s463_s17, 4  ;;  %s65_s3 = sshll.u32 %s464_s19, 4  ;;  %s51_s18 = int_to_ptr.vmem [resolvable:$true] %s50_s18  ;;  %s66_s3 = int_to_ptr.vmem [resolvable:$true] %s65_s3 }
   0xc   :  { %56 = dma.hbm_to_vmem [thread:$0]  %s49_s1, 2048, %s51_s18, [#allocation7], %s460_s9, %s460_s9, %s461_s10  }
   0xd   :  { %71 = dma.hbm_to_vmem [thread:$0]  %s64_s16, 2048, %s66_s3, [#allocation10], %s460_s9, %s460_s9, %s461_s10  }
   0xe   :  { %451 = dma.done.wait [#allocation4], 256  }
   0xf   :  { %452 = vsyncadd [#allocation4], 4294967040 }
  0x10   :  { %453 = dma.done.wait [#allocation7], 4096  }
  0x11   :  { %454 = vsyncadd [#allocation7], 4294963200 }
  0x12   :  { %455 = dma.done.wait [#allocation10], 2048  }
  0x13   :  { %456 = vsyncadd [#allocation10], 4294965248  ;;  %v111_v0 = vld [vmem:[#allocation6 + $0x78] sm:$0xff]  ;;  %v110_v1 = vld [vmem:[#allocation6 + $0x70] sm:$0xff]  ;;  %s465_s24 = smov [#allocation11]  }
  0x14   :  { %116 = vmatpush.msra.mxu0 %v111_v0  ;;  %305 = vmatpush.msra.mxu3 %v111_v0  ;;  %v109_v2 = vld [vmem:[#allocation6 + $0x68] sm:$0xff]  ;;  %v108_v3 = vld [vmem:[#allocation6 + $0x60] sm:$0xff]  ;;  %v107_v4 = vld [vmem:[#allocation6 + $0x58] sm:$0xff]  ;;  %s288_s25 = sshll.u32 %s465_s24, 4  ;;  %s289_s25 = int_to_ptr.vmem [resolvable:$true] %s288_s25 }
  0x15   :  { %v156_v5 = vld [vmem:[#allocation8 + $0x78] sm:$0xff]  ;;  %v155_v6 = vld [vmem:[#allocation8 + $0x70] sm:$0xff]  ;;  %v154_v8 = vld [vmem:[#allocation8 + $0x68] sm:$0xff] }
  0x16   :  { %117 = vmatpush.msra.mxu0 %v110_v1  ;;  %306 = vmatpush.msra.mxu3 %v110_v1  ;;  %v106_v7 = vld [vmem:[#allocation6 + $0x50] sm:$0xff]  ;;  %v105_v9 = vld [vmem:[#allocation6 + $0x48] sm:$0xff]  ;;  %v153_v10 = vld [vmem:[#allocation8 + $0x60] sm:$0xff] }
  0x17   :  { %161 = vmatpush.msra.mxu1 %v156_v5  ;;  %v104_v11 = vld [vmem:[#allocation6 + $0x40] sm:$0xff]  ;;  %v152_v12 = vld [vmem:[#allocation8 + $0x58] sm:$0xff]  ;;  %v151_v14 = vld [vmem:[#allocation8 + $0x50] sm:$0xff] }
  0x18   :  { %118 = vmatpush.msra.mxu0 %v109_v2  ;;  %307 = vmatpush.msra.mxu3 %v109_v2  ;;  %v103_v13 = vld [vmem:[#allocation6 + $0x38] sm:$0xff]  ;;  %v102_v15 = vld [vmem:[#allocation6 + $0x30] sm:$0xff]  ;;  %v150_v16 = vld [vmem:[#allocation8 + $0x48] sm:$0xff] }
  0x19   :  { %162 = vmatpush.msra.mxu1 %v155_v6  ;;  %v101_v17 = vld [vmem:[#allocation6 + $0x28] sm:$0xff]  ;;  %v149_v18 = vld [vmem:[#allocation8 + $0x40] sm:$0xff]  ;;  %v148_v20 = vld [vmem:[#allocation8 + $0x38] sm:$0xff] }
  0x1a   :  { %119 = vmatpush.msra.mxu0 %v108_v3  ;;  %308 = vmatpush.msra.mxu3 %v108_v3  ;;  %v100_v19 = vld [vmem:[#allocation6 + $0x20] sm:$0xff]  ;;  %v99_v21 = vld [vmem:[#allocation6 + $0x18] sm:$0xff]  ;;  %v147_v22 = vld [vmem:[#allocation8 + $0x30] sm:$0xff] }
  0x1b   :  { %163 = vmatpush.msra.mxu1 %v154_v8  ;;  %v98_v23 = vld [vmem:[#allocation6 + $0x10] sm:$0xff]  ;;  %v146_v24 = vld [vmem:[#allocation8 + $0x28] sm:$0xff]  ;;  %v145_v26 = vld [vmem:[#allocation8 + $0x20] sm:$0xff] }
  0x1c   :  { %120 = vmatpush.msra.mxu0 %v107_v4  ;;  %309 = vmatpush.msra.mxu3 %v107_v4  ;;  %v97_v25 = vld [vmem:[#allocation6 + $0x8] sm:$0xff]  ;;  %v96_v27 = vld [vmem:[#allocation6] sm:$0xff]  ;;  %v94_v28 = vld [vmem:[#allocation3] sm:$0xff] }
  0x1d   :  { %164 = vmatpush.msra.mxu1 %v153_v10  ;;  %v95_v29 = vld [vmem:[#allocation3 + $0x8] sm:$0xff]  ;;  %v143_v31 = vld [vmem:[#allocation8 + $0x10] sm:$0xff]  ;;  %v142_v32 = vld [vmem:[#allocation8 + $0x8] sm:$0xff] }
  0x1e   :  { %121 = vmatpush.msra.mxu0 %v106_v7  ;;  %310 = vmatpush.msra.mxu3 %v106_v7  ;;  %v144_v30 = vld [vmem:[#allocation8 + $0x18] sm:$0xff]  ;;  %v141_v33 = vld [vmem:[#allocation8] sm:$0xff]  ;;  %v202_v35 = vld [vmem:[#allocation9 + $0x70] sm:$0xff] }
  0x1f   :  { %165 = vmatpush.msra.mxu1 %v152_v12  ;;  %v203_v34 = vld [vmem:[#allocation9 + $0x78] sm:$0xff]  ;;  %v201_v36 = vld [vmem:[#allocation9 + $0x68] sm:$0xff]  ;;  %v200_v37 = vld [vmem:[#allocation9 + $0x60] sm:$0xff] }
  0x20   :  { %122 = vmatpush.msra.mxu0 %v105_v9  ;;  %311 = vmatpush.msra.mxu3 %v105_v9  ;;  %v199_v38 = vld [vmem:[#allocation9 + $0x58] sm:$0xff]  ;;  %v198_v39 = vld [vmem:[#allocation9 + $0x50] sm:$0xff]  ;;  %v197_v40 = vld [vmem:[#allocation9 + $0x48] sm:$0xff] }
  0x21   :  { %166 = vmatpush.msra.mxu1 %v151_v14  ;;  %208 = vmatpush.msra.mxu2 %v203_v34  ;;  %v196_v41 = vld [vmem:[#allocation9 + $0x40] sm:$0xff]  ;;  %v195_v42 = vld [vmem:[#allocation9 + $0x38] sm:$0xff]  ;;  %v328_v43 = vld [vmem:[%s547_s2] ss:$0 sm:$0xff] }
  0x22   :  { %123 = vmatpush.msra.mxu0 %v104_v11  ;;  %312 = vmatpush.msra.mxu3 %v104_v11  ;;  %v194_v44 = vld [vmem:[#allocation9 + $0x30] sm:$0xff]  ;;  %v193_v45 = vld [vmem:[#allocation9 + $0x28] sm:$0xff]  ;;  %v192_v48 = vld [vmem:[#allocation9 + $0x20] sm:$0xff] }
  0x23   :  { %167 = vmatpush.msra.mxu1 %v150_v16  ;;  %209 = vmatpush.msra.mxu2 %v202_v35  ;;  %v191_v50 = vld [vmem:[#allocation9 + $0x18] sm:$0xff]  ;;  %v190_v54 = vld [vmem:[#allocation9 + $0x10] sm:$0xff]  ;;  %v189_v55 = vld [vmem:[#allocation9 + $0x8] sm:$0xff] }
  0x24   :  { %124 = vmatpush.msra.mxu0 %v103_v13  ;;  %313 = vmatpush.msra.mxu3 %v103_v13  ;;  %v188_v56 = vld [vmem:[#allocation9] sm:$0xff]  ;;  %v329_v57 = vld [vmem:[%s549_s4] ss:$0 sm:$0xff]  ;;  %s290_s4 = sshll.u32 %s552_s7, 4  ;;  %s291_s4 = int_to_ptr.hbm [resolvable:$true] %s290_s4 }
  0x25   :  { %168 = vmatpush.msra.mxu1 %v149_v18  ;;  %210 = vmatpush.msra.mxu2 %v201_v36  ;;  %v330_v0 = vld [vmem:[%s551_s6] ss:$0 sm:$0xff] }
  0x26   :  { %125 = vmatpush.msra.mxu0 %v102_v15  ;;  %314 = vmatpush.msra.mxu3 %v102_v15 }
  0x27   :  { %169 = vmatpush.msra.mxu1 %v148_v20  ;;  %211 = vmatpush.msra.mxu2 %v200_v37 }
  0x28   :  { %126 = vmatpush.msra.mxu0 %v101_v17  ;;  %315 = vmatpush.msra.mxu3 %v101_v17 }
  0x29   :  { %170 = vmatpush.msra.mxu1 %v147_v22  ;;  %212 = vmatpush.msra.mxu2 %v199_v38 }
  0x2a   :  { %127 = vmatpush.msra.mxu0 %v100_v19  ;;  %316 = vmatpush.msra.mxu3 %v100_v19 }
  0x2b   :  { %171 = vmatpush.msra.mxu1 %v146_v24  ;;  %213 = vmatpush.msra.mxu2 %v198_v39 }
  0x2c   :  { %128 = vmatpush.msra.mxu0 %v99_v21  ;;  %317 = vmatpush.msra.mxu3 %v99_v21 }
  0x2d   :  { %172 = vmatpush.msra.mxu1 %v145_v26  ;;  %214 = vmatpush.msra.mxu2 %v197_v40 }
  0x2e   :  { %129 = vmatpush.msra.mxu0 %v98_v23  ;;  %318 = vmatpush.msra.mxu3 %v98_v23 }
  0x2f   :  { %173 = vmatpush.msra.mxu1 %v144_v30  ;;  %215 = vmatpush.msra.mxu2 %v196_v41 }
  0x30   :  { %130 = vmatpush.msra.mxu0 %v97_v25  ;;  %319 = vmatpush.msra.mxu3 %v97_v25 }
  0x31   :  { %174 = vmatpush.msra.mxu1 %v143_v31  ;;  %216 = vmatpush.msra.mxu2 %v195_v42 }
  0x32   :  { %131 = vmatpush.msra.mxu0 %v96_v27  ;;  %320 = vmatpush.msra.mxu3 %v96_v27 }
  0x33   :  { %132 = vmatmul.f32.vlgmr.msra.gmra.mxu0 %v94_v28  ;;  %135 = vmatmul.f32.vlgmr.msra.gmra.mxu3 %v95_v29 }
  0x34   :  { %175 = vmatpush.msra.mxu1 %v142_v32  ;;  %217 = vmatpush.msra.mxu2 %v194_v44 }
  0x36   :  { %176 = vmatpush.msra.mxu1 %v141_v33  ;;  %218 = vmatpush.msra.mxu2 %v193_v45 }
  0x38   :  { %219 = vmatpush.msra.mxu2 %v192_v48 }
  0x3a   :  { %220 = vmatpush.msra.mxu2 %v191_v50 }
  0x3c   :  { %221 = vmatpush.msra.mxu2 %v190_v54 }
  0x3e   :  { %222 = vmatpush.msra.mxu2 %v189_v55 }
  0x40   :  { %223 = vmatpush.msra.mxu2 %v188_v56 }
  0xb0   :  { %v133_v46 = vpop.f32.mrf.mxu0 }
  0xb1   :  { %v134_v47 = vadd.f32 %v328_v43, %v133_v46 }
  0xb3   :  { %v139_v49 = vmax.f32 %v134_v47, 0.0 }
  0xb5   :  { %177 = vmatmul.f32.vlgmr.msra.gmra.mxu1 %v139_v49 }
  0xb6   :  { %v136_v51 = vpop.f32.mrf.mxu3 }
  0xb7   :  { %v137_v52 = vadd.f32 %v328_v43, %v136_v51 }
  0xb9   :  { %v140_v53 = vmax.f32 %v137_v52, 0.0 }
  0xbd   :  { %180 = vmatmul.f32.gmra.mxu1 %v140_v53 }
 0x132   :  { %v178_v58 = vpop.f32.mrf.mxu1 }
 0x133   :  { %v179_v59 = vadd.f32 %v329_v57, %v178_v58 }
 0x135   :  { %v184_v60 = vmax.f32 %v179_v59, 0.0 }
 0x137   :  { %224 = vmatmul.f32.vlgmr.msra.gmra.mxu2 %v184_v60 }
 0x13a   :  { %v181_v61 = vpop.f32.mrf.mxu1 }
 0x13b   :  { %v182_v62 = vadd.f32 %v329_v57, %v181_v61 }
 0x13d   :  { %v185_v63 = vmax.f32 %v182_v62, 0.0 }
 0x13f   :  { %227 = vmatmul.f32.gmra.mxu2 %v185_v63 }
 0x1ba   :  { %v225_v1 = vpop.f32.mrf.mxu2 }
 0x1bb   :  { %v226_v2 = vadd.f32 %v330_v0, %v225_v1 }
 0x1bd   :  { %231 = vst [vmem:[#allocation11] sm:$0xff] %v226_v2 }
 0x1c2   :  { %v228_v3 = vpop.f32.mrf.mxu2 }
 0x1c3   :  { %v229_v4 = vadd.f32 %v330_v0, %v228_v3 }
 0x1c5   :  { %232 = vst [vmem:[#allocation11 + $0x8] sm:$0xff] %v229_v4 }
 0x1c6   :  { %296 = dma.vmem_to_hbm [thread:$0]  %s289_s25, 256, %s291_s4, [#allocation5], %s460_s9, %s460_s9, %s461_s10  }
 0x1c7   :  { %457 = dma.done.wait [#allocation5], 256  }
 0x1c8   :  { %458 = vsyncadd [#allocation5], 4294967040 }
 0x1c9   :  { %301 = vsyncpa [#allocation4], 1 }
 0x1ca   :  { %302 = vsyncpa [#allocation7], 1 }
 0x1cb   :  { %303 = vsyncpa [#allocation10], 1 }
 0x1cc   :  { %304 = vsyncpa [#allocation5], 1 }

// kernel: tpu_custom_call.1
= control target key start
LH: loop header
LB: loop body
LE: loop exit
PB: predicated region body
PF: predicated region fallthrough
CT: control target
= control target key end

     0   :  { %12 = vsyncpa [#allocation4], 0  ;;  %s545_s0 = inlined_call_operand.hbm [shape: f32[16,128], index: 0, kind: input, shape index: {}]   ;;  %s546_s1 = inlined_call_operand.hbm [shape: f32[128,128], index: 1, kind: input, shape index: {}]   ;;  %s547_s2 = inlined_call_operand.vmem [shape: f32[1,128], index: 2, kind: input, shape index: {}]   ;;  %s548_s3 = inlined_call_operand.hbm [shape: f32[128,128], index: 3, kind: input, shape index: {}]   ;;  %s549_s4 = inlined_call_operand.vmem [shape: f32[1,128], index: 4, kind: input, shape index: {}]   ;;  %s550_s5 = inlined_call_operand.hbm [shape: f32[128,128], index: 5, kind: input, shape index: {}]   ;;  %s551_s6 = inlined_call_operand.vmem [shape: f32[1,128], index: 6, kind: input, shape index: {}]   ;;  %s552_s7 = inlined_call_operand.hbm [shape: f32[16,128], index: 7, kind: output, shape index: {}]  }
   0x1   :  { %13 = vsyncpa [#allocation7], 0 }
   0x2   :  { %14 = vsyncpa [#allocation10], 0 }
   0x3   :  { %15 = vsyncpa [#allocation5], 0  ;;  %s33_s26 = sshll.u32 %s546_s1, 4  ;;  %s459_s27 = smov [#allocation6]   ;;  %s34_s26 = int_to_ptr.hbm [resolvable:$true] %s33_s26 }
   0x4   :  { %s35_s28 = sshll.u32 %s459_s27, 4  ;;  %s20_s8 = sshll.u32 %s545_s0, 4  ;;  %s36_s28 = int_to_ptr.vmem [resolvable:$true] %s35_s28  ;;  %s21_s8 = int_to_ptr.hbm [resolvable:$true] %s20_s8 }
   0x5   :  { %s460_s9 = smov 128   ;;  %s461_s10 = smov 8  }
   0x6   :  { %41 = dma.hbm_to_vmem [thread:$0]  %s34_s26, 2048, %s36_s28, [#allocation7], %s460_s9, %s460_s9, %s461_s10  }
   0x7   :  { %s462_s11 = smov [#allocation3]   ;;  %s48_s1 = sshll.u32 %s548_s3, 4  ;;  %s49_s1 = int_to_ptr.hbm [resolvable:$true] %s48_s1 }
   0x8   :  { %s22_s12 = sshll.u32 %s462_s11, 4  ;;  %s63_s16 = sshll.u32 %s550_s5, 4  ;;  %s23_s12 = int_to_ptr.vmem [resolvable:$true] %s22_s12  ;;  %s64_s16 = int_to_ptr.hbm [resolvable:$true] %s63_s16 }
   0x9   :  { %28 = dma.hbm_to_vmem [thread:$0]  %s21_s8, 256, %s23_s12, [#allocation4], %s460_s9, %s460_s9, %s461_s10  }
   0xa   :  { %s463_s17 = smov [#allocation8]   ;;  %s464_s19 = smov [#allocation9]  }
   0xb   :  { %s50_s18 = sshll.u32 %s463_s17, 4  ;;  %s65_s3 = sshll.u32 %s464_s19, 4  ;;  %s51_s18 = int_to_ptr.vmem [resolvable:$true] %s50_s18  ;;  %s66_s3 = int_to_ptr.vmem [resolvable:$true] %s65_s3 }
   0xc   :  { %56 = dma.hbm_to_vmem [thread:$0]  %s49_s1, 2048, %s51_s18, [#allocation7], %s460_s9, %s460_s9, %s461_s10  }
   0xd   :  { %71 = dma.hbm_to_vmem [thread:$0]  %s64_s16, 2048, %s66_s3, [#allocation10], %s460_s9, %s460_s9, %s461_s10  }
   0xe   :  { %451 = dma.done.wait [#allocation4], 256  }
   0xf   :  { %452 = vsyncadd [#allocation4], 4294967040 }
  0x10   :  { %453 = dma.done.wait [#allocation7], 4096  }
  0x11   :  { %454 = vsyncadd [#allocation7], 4294963200 }
  0x12   :  { %455 = dma.done.wait [#allocation10], 2048  }
  0x13   :  { %456 = vsyncadd [#allocation10], 4294965248  ;;  %v111_v0 = vld [vmem:[#allocation6 + $0x78] sm:$0xff]  ;;  %v110_v1 = vld [vmem:[#allocation6 + $0x70] sm:$0xff]  ;;  %s465_s24 = smov [#allocation11]  }
  0x14   :  { %116 = vmatpush.msra.mxu0 %v111_v0  ;;  %305 = vmatpush.msra.mxu3 %v111_v0  ;;  %v109_v2 = vld [vmem:[#allocation6 + $0x68] sm:$0xff]  ;;  %v108_v3 = vld [vmem:[#allocation6 + $0x60] sm:$0xff]  ;;  %v107_v4 = vld [vmem:[#allocation6 + $0x58] sm:$0xff]  ;;  %s288_s25 = sshll.u32 %s465_s24, 4  ;;  %s289_s25 = int_to_ptr.vmem [resolvable:$true] %s288_s25 }
  0x15   :  { %v156_v5 = vld [vmem:[#allocation8 + $0x78] sm:$0xff]  ;;  %v155_v6 = vld [vmem:[#allocation8 + $0x70] sm:$0xff]  ;;  %v154_v8 = vld [vmem:[#allocation8 + $0x68] sm:$0xff] }
  0x16   :  { %117 = vmatpush.msra.mxu0 %v110_v1  ;;  %306 = vmatpush.msra.mxu3 %v110_v1  ;;  %v106_v7 = vld [vmem:[#allocation6 + $0x50] sm:$0xff]  ;;  %v105_v9 = vld [vmem:[#allocation6 + $0x48] sm:$0xff]  ;;  %v153_v10 = vld [vmem:[#allocation8 + $0x60] sm:$0xff] }
  0x17   :  { %161 = vmatpush.msra.mxu1 %v156_v5  ;;  %v104_v11 = vld [vmem:[#allocation6 + $0x40] sm:$0xff]  ;;  %v152_v12 = vld [vmem:[#allocation8 + $0x58] sm:$0xff]  ;;  %v151_v14 = vld [vmem:[#allocation8 + $0x50] sm:$0xff] }
  0x18   :  { %118 = vmatpush.msra.mxu0 %v109_v2  ;;  %307 = vmatpush.msra.mxu3 %v109_v2  ;;  %v103_v13 = vld [vmem:[#allocation6 + $0x38] sm:$0xff]  ;;  %v102_v15 = vld [vmem:[#allocation6 + $0x30] sm:$0xff]  ;;  %v150_v16 = vld [vmem:[#allocation8 + $0x48] sm:$0xff] }
  0x19   :  { %162 = vmatpush.msra.mxu1 %v155_v6  ;;  %v101_v17 = vld [vmem:[#allocation6 + $0x28] sm:$0xff]  ;;  %v149_v18 = vld [vmem:[#allocation8 + $0x40] sm:$0xff]  ;;  %v148_v20 = vld [vmem:[#allocation8 + $0x38] sm:$0xff] }
  0x1a   :  { %119 = vmatpush.msra.mxu0 %v108_v3  ;;  %308 = vmatpush.msra.mxu3 %v108_v3  ;;  %v100_v19 = vld [vmem:[#allocation6 + $0x20] sm:$0xff]  ;;  %v99_v21 = vld [vmem:[#allocation6 + $0x18] sm:$0xff]  ;;  %v147_v22 = vld [vmem:[#allocation8 + $0x30] sm:$0xff] }
  0x1b   :  { %163 = vmatpush.msra.mxu1 %v154_v8  ;;  %v98_v23 = vld [vmem:[#allocation6 + $0x10] sm:$0xff]  ;;  %v146_v24 = vld [vmem:[#allocation8 + $0x28] sm:$0xff]  ;;  %v145_v26 = vld [vmem:[#allocation8 + $0x20] sm:$0xff] }
  0x1c   :  { %120 = vmatpush.msra.mxu0 %v107_v4  ;;  %309 = vmatpush.msra.mxu3 %v107_v4  ;;  %v97_v25 = vld [vmem:[#allocation6 + $0x8] sm:$0xff]  ;;  %v96_v27 = vld [vmem:[#allocation6] sm:$0xff]  ;;  %v94_v28 = vld [vmem:[#allocation3] sm:$0xff] }
  0x1d   :  { %164 = vmatpush.msra.mxu1 %v153_v10  ;;  %v95_v29 = vld [vmem:[#allocation3 + $0x8] sm:$0xff]  ;;  %v143_v31 = vld [vmem:[#allocation8 + $0x10] sm:$0xff]  ;;  %v142_v32 = vld [vmem:[#allocation8 + $0x8] sm:$0xff] }
  0x1e   :  { %121 = vmatpush.msra.mxu0 %v106_v7  ;;  %310 = vmatpush.msra.mxu3 %v106_v7  ;;  %v144_v30 = vld [vmem:[#allocation8 + $0x18] sm:$0xff]  ;;  %v141_v33 = vld [vmem:[#allocation8] sm:$0xff]  ;;  %v202_v35 = vld [vmem:[#allocation9 + $0x70] sm:$0xff] }
  0x1f   :  { %165 = vmatpush.msra.mxu1 %v152_v12  ;;  %v203_v34 = vld [vmem:[#allocation9 + $0x78] sm:$0xff]  ;;  %v201_v36 = vld [vmem:[#allocation9 + $0x68] sm:$0xff]  ;;  %v200_v37 = vld [vmem:[#allocation9 + $0x60] sm:$0xff] }
  0x20   :  { %122 = vmatpush.msra.mxu0 %v105_v9  ;;  %311 = vmatpush.msra.mxu3 %v105_v9  ;;  %v199_v38 = vld [vmem:[#allocation9 + $0x58] sm:$0xff]  ;;  %v198_v39 = vld [vmem:[#allocation9 + $0x50] sm:$0xff]  ;;  %v197_v40 = vld [vmem:[#allocation9 + $0x48] sm:$0xff] }
  0x21   :  { %166 = vmatpush.msra.mxu1 %v151_v14  ;;  %208 = vmatpush.msra.mxu2 %v203_v34  ;;  %v196_v41 = vld [vmem:[#allocation9 + $0x40] sm:$0xff]  ;;  %v195_v42 = vld [vmem:[#allocation9 + $0x38] sm:$0xff]  ;;  %v328_v43 = vld [vmem:[%s547_s2] ss:$0 sm:$0xff] }
  0x22   :  { %123 = vmatpush.msra.mxu0 %v104_v11  ;;  %312 = vmatpush.msra.mxu3 %v104_v11  ;;  %v194_v44 = vld [vmem:[#allocation9 + $0x30] sm:$0xff]  ;;  %v193_v45 = vld [vmem:[#allocation9 + $0x28] sm:$0xff]  ;;  %v192_v48 = vld [vmem:[#allocation9 + $0x20] sm:$0xff] }
  0x23   :  { %167 = vmatpush.msra.mxu1 %v150_v16  ;;  %209 = vmatpush.msra.mxu2 %v202_v35  ;;  %v191_v50 = vld [vmem:[#allocation9 + $0x18] sm:$0xff]  ;;  %v190_v54 = vld [vmem:[#allocation9 + $0x10] sm:$0xff]  ;;  %v189_v55 = vld [vmem:[#allocation9 + $0x8] sm:$0xff] }
  0x24   :  { %124 = vmatpush.msra.mxu0 %v103_v13  ;;  %313 = vmatpush.msra.mxu3 %v103_v13  ;;  %v188_v56 = vld [vmem:[#allocation9] sm:$0xff]  ;;  %v329_v57 = vld [vmem:[%s549_s4] ss:$0 sm:$0xff]  ;;  %s290_s4 = sshll.u32 %s552_s7, 4  ;;  %s291_s4 = int_to_ptr.hbm [resolvable:$true] %s290_s4 }
  0x25   :  { %168 = vmatpush.msra.mxu1 %v149_v18  ;;  %210 = vmatpush.msra.mxu2 %v201_v36  ;;  %v330_v0 = vld [vmem:[%s551_s6] ss:$0 sm:$0xff] }
  0x26   :  { %125 = vmatpush.msra.mxu0 %v102_v15  ;;  %314 = vmatpush.msra.mxu3 %v102_v15 }
  0x27   :  { %169 = vmatpush.msra.mxu1 %v148_v20  ;;  %211 = vmatpush.msra.mxu2 %v200_v37 }
  0x28   :  { %126 = vmatpush.msra.mxu0 %v101_v17  ;;  %315 = vmatpush.msra.mxu3 %v101_v17 }
  0x29   :  { %170 = vmatpush.msra.mxu1 %v147_v22  ;;  %212 = vmatpush.msra.mxu2 %v199_v38 }
  0x2a   :  { %127 = vmatpush.msra.mxu0 %v100_v19  ;;  %316 = vmatpush.msra.mxu3 %v100_v19 }
  0x2b   :  { %171 = vmatpush.msra.mxu1 %v146_v24  ;;  %213 = vmatpush.msra.mxu2 %v198_v39 }
  0x2c   :  { %128 = vmatpush.msra.mxu0 %v99_v21  ;;  %317 = vmatpush.msra.mxu3 %v99_v21 }
  0x2d   :  { %172 = vmatpush.msra.mxu1 %v145_v26  ;;  %214 = vmatpush.msra.mxu2 %v197_v40 }
  0x2e   :  { %129 = vmatpush.msra.mxu0 %v98_v23  ;;  %318 = vmatpush.msra.mxu3 %v98_v23 }
  0x2f   :  { %173 = vmatpush.msra.mxu1 %v144_v30  ;;  %215 = vmatpush.msra.mxu2 %v196_v41 }
  0x30   :  { %130 = vmatpush.msra.mxu0 %v97_v25  ;;  %319 = vmatpush.msra.mxu3 %v97_v25 }
  0x31   :  { %174 = vmatpush.msra.mxu1 %v143_v31  ;;  %216 = vmatpush.msra.mxu2 %v195_v42 }
  0x32   :  { %131 = vmatpush.msra.mxu0 %v96_v27  ;;  %320 = vmatpush.msra.mxu3 %v96_v27 }
  0x33   :  { %132 = vmatmul.f32.vlgmr.msra.gmra.mxu0 %v94_v28  ;;  %135 = vmatmul.f32.vlgmr.msra.gmra.mxu3 %v95_v29 }
  0x34   :  { %175 = vmatpush.msra.mxu1 %v142_v32  ;;  %217 = vmatpush.msra.mxu2 %v194_v44 }
  0x36   :  { %176 = vmatpush.msra.mxu1 %v141_v33  ;;  %218 = vmatpush.msra.mxu2 %v193_v45 }
  0x38   :  { %219 = vmatpush.msra.mxu2 %v192_v48 }
  0x3a   :  { %220 = vmatpush.msra.mxu2 %v191_v50 }
  0x3c   :  { %221 = vmatpush.msra.mxu2 %v190_v54 }
  0x3e   :  { %222 = vmatpush.msra.mxu2 %v189_v55 }
  0x40   :  { %223 = vmatpush.msra.mxu2 %v188_v56 }
  0xb0   :  { %v133_v46 = vpop.f32.mrf.mxu0 }
  0xb1   :  { %v134_v47 = vadd.f32 %v328_v43, %v133_v46 }
  0xb3   :  { %v139_v49 = vmax.f32 %v134_v47, 0.0 }
  0xb5   :  { %177 = vmatmul.f32.vlgmr.msra.gmra.mxu1 %v139_v49 }
  0xb6   :  { %v136_v51 = vpop.f32.mrf.mxu3 }
  0xb7   :  { %v137_v52 = vadd.f32 %v328_v43, %v136_v51 }
  0xb9   :  { %v140_v53 = vmax.f32 %v137_v52, 0.0 }
  0xbd   :  { %180 = vmatmul.f32.gmra.mxu1 %v140_v53 }
 0x132   :  { %v178_v58 = vpop.f32.mrf.mxu1 }
 0x133   :  { %v179_v59 = vadd.f32 %v329_v57, %v178_v58 }
 0x135   :  { %v184_v60 = vmax.f32 %v179_v59, 0.0 }
 0x137   :  { %224 = vmatmul.f32.vlgmr.msra.gmra.mxu2 %v184_v60 }
 0x13a   :  { %v181_v61 = vpop.f32.mrf.mxu1 }
 0x13b   :  { %v182_v62 = vadd.f32 %v329_v57, %v181_v61 }
 0x13d   :  { %v185_v63 = vmax.f32 %v182_v62, 0.0 }
 0x13f   :  { %227 = vmatmul.f32.gmra.mxu2 %v185_v63 }
 0x1ba   :  { %v225_v1 = vpop.f32.mrf.mxu2 }
 0x1bb   :  { %v226_v2 = vadd.f32 %v330_v0, %v225_v1 }
 0x1bd   :  { %231 = vst [vmem:[#allocation11] sm:$0xff] %v226_v2 }
 0x1c2   :  { %v228_v3 = vpop.f32.mrf.mxu2 }
 0x1c3   :  { %v229_v4 = vadd.f32 %v330_v0, %v228_v3 }
 0x1c5   :  { %232 = vst [vmem:[#allocation11 + $0x8] sm:$0xff] %v229_v4 }
 0x1c6   :  { %296 = dma.vmem_to_hbm [thread:$0]  %s289_s25, 256, %s291_s4, [#allocation5], %s460_s9, %s460_s9, %s461_s10  }
 0x1c7   :  { %457 = dma.done.wait [#allocation5], 256  }
 0x1c8   :  { %458 = vsyncadd [#allocation5], 4294967040 }
 0x1c9   :  { %301 = vsyncpa [#allocation4], 1 }
 0x1ca   :  { %302 = vsyncpa [#allocation7], 1 }
 0x1cb   :  { %303 = vsyncpa [#allocation10], 1 }
 0x1cc   :  { %304 = vsyncpa [#allocation5], 1 }

</bundles_post_ra>
